<compile_context>
chip_gen: v6e
topology: v6e:2x2x1
jax: 0.10.0
libtpu: 0.0.40
codegen_flags: <defaults>
</compile_context>

<pallas_src>
import functools

import jax
import jax.numpy as jnp
from jax.experimental import pallas as pl
from jax.experimental.pallas import tpu as pltpu

D_IN = 4       # input_size = space_dimension (3) + time_dimension (1)
WIDTH = 32     # hidden width
D_OUT = 1      # output_size
N_HIDDEN = 6   # layer_1 .. layer_6

MAX_BATCH_TILE = 2048  # lanes (batch rows) per grid step


def _swish(h):
    # activation(x) = x * sigmoid(x); exp + approx reciprocal both go to EUP.
    return h * pl.reciprocal(1.0 + jnp.exp(-h), approx=True)


def _net_kernel(x_ref, w_in_ref, b_in_ref, w_h_ref, b_h_ref,
                w_out_ref, b_out_ref, o_ref):
    # Batch-on-lanes: activations are (features, batch_tile).
    x = x_ref[...]

    def linear(w, b, h):
        return jnp.dot(w, h, preferred_element_type=jnp.float32) + b

    out = linear(w_in_ref[...], b_in_ref[...], x)          # (WIDTH, bt)

    # Three residual blocks: out += swish(W_{2k+2} @ swish(W_{2k+1} @ out))
    for blk in range(3):
        h = _swish(linear(w_h_ref[2 * blk], b_h_ref[2 * blk], out))
        out = out + _swish(linear(w_h_ref[2 * blk + 1], b_h_ref[2 * blk + 1], h))

    # Lane-dense (1, batch_tile) output store.
    o_ref[...] = linear(w_out_ref[...], b_out_ref[...], out).astype(o_ref.dtype)


def _weight_spec(shape):
    ndim = len(shape)
    return pl.BlockSpec(shape, lambda i, _n=ndim: (0,) * _n)


@functools.partial(jax.jit, static_argnames=("batch_tile",))
def _net_forward_impl(x, params, *, batch_tile):
    n, d_in = x.shape
    assert d_in == D_IN
    n_pad = pl.cdiv(n, batch_tile) * batch_tile

    # Transposed, lane-padded input: (D_IN, n_pad). Pad rows are sliced off.
    x_t = jnp.pad(x.astype(jnp.float32).T, ((0, 0), (0, n_pad - n)))

    # Stack the six hidden layers -> one weight tensor + one bias tensor.
    w_h = jnp.stack([params[f"w_{k}"] for k in range(1, 7)])   # (6, W, W)
    b_h = jnp.stack([params[f"b_{k}"] for k in range(1, 7)])   # (6, W, 1)

    out_t = pl.pallas_call(
        _net_kernel,
        out_shape=jax.ShapeDtypeStruct((D_OUT, n_pad), jnp.float32),
        grid_spec=pltpu.PrefetchScalarGridSpec(
            num_scalar_prefetch=0,
            grid=(n_pad // batch_tile,),
            in_specs=[
                pl.BlockSpec((D_IN, batch_tile), lambda i: (0, i)),
                _weight_spec((WIDTH, D_IN)),
                _weight_spec((WIDTH, 1)),
                _weight_spec((N_HIDDEN, WIDTH, WIDTH)),
                _weight_spec((N_HIDDEN, WIDTH, 1)),
                _weight_spec((D_OUT, WIDTH)),
                _weight_spec((D_OUT, 1)),
            ],
            out_specs=pl.BlockSpec((D_OUT, batch_tile), lambda i: (0, i)),
        ),
        compiler_params=pltpu.CompilerParams(
            dimension_semantics=("parallel",),
        ),
    )(x_t, params["w_in"], params["b_in"], w_h, b_h,
      params["w_out"], params["b_out"])

    return out_t[:, :n].T   # (n, D_OUT)


def _choose_batch_tile(n):
    # Big tiles amortize the ~0.35us per-grid-step overhead; keep >= 2 grid
    # steps when N allows so v7x megacore has work for both TensorCores.
    target = min(MAX_BATCH_TILE, max(128, -(-n // 2)))
    return int(-(-target // 128) * 128)


def net_forward(x, params):
    """x: (N, D_IN) float32 collocation points -> (N, D_OUT)."""
    return _net_forward_impl(x, params, batch_tile=_choose_batch_tile(x.shape[0]))


def init_params(key):
    """nn.Linear-style init, PyTorch-native orientation: W (out, in), b (out, 1)."""
    params = {}
    layer_dims = {"in": (D_IN, WIDTH)}
    for k in range(1, 7):
        layer_dims[str(k)] = (WIDTH, WIDTH)
    layer_dims["out"] = (WIDTH, D_OUT)
    for name, (fan_in, fan_out) in layer_dims.items():
        key, kw, kb = jax.random.split(key, 3)
        bound = 1.0 / float(fan_in) ** 0.5
        params[f"w_{name}"] = jax.random.uniform(
            kw, (fan_out, fan_in), jnp.float32, -bound, bound)
        params[f"b_{name}"] = jax.random.uniform(
            kb, (fan_out, 1), jnp.float32, -bound, bound)
    return params


def net_forward_ref(x, params):
    """Pure-JAX reference identical to the PyTorch forward."""
    def lin(h, name):
        return h @ params[f"w_{name}"].T + params[f"b_{name}"][:, 0]

    def sw(h):
        return h * jax.nn.sigmoid(h)

    out = lin(x, "in")
    out = out + sw(lin(sw(lin(out, "1")), "2"))
    out = out + sw(lin(sw(lin(out, "3")), "4"))
    out = out + sw(lin(sw(lin(out, "5")), "6"))
    return lin(out, "out")


if __name__ == "__main__":
    key = jax.random.PRNGKey(0)
    k_params, k_x = jax.random.split(key)

    params = init_params(k_params)
    # N collocation points, each (x, y, z, t)
    N = 256
    x = jax.random.normal(k_x, (N, D_IN), jnp.float32)

    y = jax.block_until_ready(net_forward(x, params))
    y_ref = net_forward_ref(x, params)

    assert y.shape == (N, D_OUT)
    # In-kernel sigmoid uses the EUP approximate reciprocal -> small bounded
    # deviation vs the exact reference, hence the relaxed tolerance.
    max_err = float(jnp.max(jnp.abs(y - y_ref)))
    assert max_err < 2e-2, max_err
    print("KERNEL_OK")
</pallas_src>

<mosaic_0001>
module attributes {stable_mosaic.version = 11 : i64} {
  func.func @_net_kernel(%arg0: i32, %arg1: memref<4x128xf32, #tpu.memory_space<vmem>>, %arg2: memref<32x4xf32, #tpu.memory_space<vmem>>, %arg3: memref<32x1xf32, #tpu.memory_space<vmem>>, %arg4: memref<6x32x32xf32, #tpu.memory_space<vmem>>, %arg5: memref<6x32x1xf32, #tpu.memory_space<vmem>>, %arg6: memref<1x32xf32, #tpu.memory_space<vmem>>, %arg7: memref<1x1xf32, #tpu.memory_space<vmem>>, %arg8: memref<1x128xf32, #tpu.memory_space<vmem>>) attributes {dimension_semantics = [#tpu.dimension_semantics<parallel>], iteration_bounds = array<i64: 2>, scalar_prefetch = 0 : i64, scratch_operands = 0 : i64, tpu.core_type = #tpu.core_type<tc>, window_params = [{transform_indices = @transform_0, window_bounds = array<i64: 4, 128>}, {pipeline_mode = #tpu.pipeline_mode<synchronous>, transform_indices = @transform_1, window_bounds = array<i64: 32, 4>}, {pipeline_mode = #tpu.pipeline_mode<synchronous>, transform_indices = @transform_2, window_bounds = array<i64: 32, 1>}, {pipeline_mode = #tpu.pipeline_mode<synchronous>, transform_indices = @transform_3, window_bounds = array<i64: 6, 32, 32>}, {pipeline_mode = #tpu.pipeline_mode<synchronous>, transform_indices = @transform_4, window_bounds = array<i64: 6, 32, 1>}, {pipeline_mode = #tpu.pipeline_mode<synchronous>, transform_indices = @transform_5, window_bounds = array<i64: 1, 32>}, {pipeline_mode = #tpu.pipeline_mode<synchronous>, transform_indices = @transform_6, window_bounds = array<i64: 1, 1>}, {transform_indices = @transform_7, window_bounds = array<i64: 1, 128>}]} {
    %c0 = arith.constant 0 : index
    %c0_0 = arith.constant 0 : index
    %0 = vector.load %arg1[%c0, %c0_0] : memref<4x128xf32, #tpu.memory_space<vmem>>, vector<4x128xf32>
    %c0_1 = arith.constant 0 : index
    %c0_2 = arith.constant 0 : index
    %1 = vector.load %arg2[%c0_1, %c0_2] : memref<32x4xf32, #tpu.memory_space<vmem>>, vector<32x4xf32>
    %c0_3 = arith.constant 0 : index
    %c0_4 = arith.constant 0 : index
    %2 = vector.load %arg3[%c0_3, %c0_4] : memref<32x1xf32, #tpu.memory_space<vmem>>, vector<32x1xf32>
    %cst = arith.constant dense<0.000000e+00> : vector<32x128xf32>
    %3 = tpu.matmul %1, %0, %cst {dimension_numbers = #tpu.dot_dimension_numbers<[1], [0], [0], [1], [0, 0, 1, 1], [], []>} : vector<32x4xf32>, vector<4x128xf32>, vector<32x128xf32> -> vector<32x128xf32>
    %4 = vector.broadcast %2 : vector<32x1xf32> to vector<32x128xf32>
    %5 = arith.addf %3, %4 : vector<32x128xf32>
    %c0_5 = arith.constant 0 : index
    %c0_6 = arith.constant 0 : index
    %c0_7 = arith.constant 0 : index
    %6 = vector.load %arg4[%c0_5, %c0_6, %c0_7] : memref<6x32x32xf32, #tpu.memory_space<vmem>>, vector<1x32x32xf32>
    %7 = vector.shape_cast %6 : vector<1x32x32xf32> to vector<32x32xf32>
    %c0_8 = arith.constant 0 : index
    %c0_9 = arith.constant 0 : index
    %c0_10 = arith.constant 0 : index
    %8 = vector.load %arg5[%c0_8, %c0_9, %c0_10] : memref<6x32x1xf32, #tpu.memory_space<vmem>>, vector<1x32x1xf32>
    %9 = vector.shape_cast %8 : vector<1x32x1xf32> to vector<32x1xf32>
    %cst_11 = arith.constant dense<0.000000e+00> : vector<32x128xf32>
    %10 = tpu.matmul %7, %5, %cst_11 {dimension_numbers = #tpu.dot_dimension_numbers<[1], [0], [0], [1], [0, 0, 1, 1], [], []>} : vector<32x32xf32>, vector<32x128xf32>, vector<32x128xf32> -> vector<32x128xf32>
    %11 = vector.broadcast %9 : vector<32x1xf32> to vector<32x128xf32>
    %12 = arith.addf %10, %11 : vector<32x128xf32>
    %cst_12 = arith.constant 0.000000e+00 : f32
    %13 = vector.broadcast %cst_12 : f32 to vector<32x128xf32>
    %14 = arith.subf %13, %12 : vector<32x128xf32>
    %15 = math.exp %14 : vector<32x128xf32>
    %cst_13 = arith.constant 1.000000e+00 : f32
    %16 = vector.broadcast %cst_13 : f32 to vector<32x128xf32>
    %17 = arith.addf %16, %15 : vector<32x128xf32>
    %18 = tpu.reciprocal %17 {approx = true} : vector<32x128xf32> -> vector<32x128xf32>
    %19 = arith.mulf %12, %18 : vector<32x128xf32>
    %c1 = arith.constant 1 : index
    %c0_14 = arith.constant 0 : index
    %c0_15 = arith.constant 0 : index
    %20 = vector.load %arg4[%c1, %c0_14, %c0_15] : memref<6x32x32xf32, #tpu.memory_space<vmem>>, vector<1x32x32xf32>
    %21 = vector.shape_cast %20 : vector<1x32x32xf32> to vector<32x32xf32>
    %c1_16 = arith.constant 1 : index
    %c0_17 = arith.constant 0 : index
    %c0_18 = arith.constant 0 : index
    %22 = vector.load %arg5[%c1_16, %c0_17, %c0_18] : memref<6x32x1xf32, #tpu.memory_space<vmem>>, vector<1x32x1xf32>
    %23 = vector.shape_cast %22 : vector<1x32x1xf32> to vector<32x1xf32>
    %cst_19 = arith.constant dense<0.000000e+00> : vector<32x128xf32>
    %24 = tpu.matmul %21, %19, %cst_19 {dimension_numbers = #tpu.dot_dimension_numbers<[1], [0], [0], [1], [0, 0, 1, 1], [], []>} : vector<32x32xf32>, vector<32x128xf32>, vector<32x128xf32> -> vector<32x128xf32>
    %25 = vector.broadcast %23 : vector<32x1xf32> to vector<32x128xf32>
    %26 = arith.addf %24, %25 : vector<32x128xf32>
    %cst_20 = arith.constant 0.000000e+00 : f32
    %27 = vector.broadcast %cst_20 : f32 to vector<32x128xf32>
    %28 = arith.subf %27, %26 : vector<32x128xf32>
    %29 = math.exp %28 : vector<32x128xf32>
    %cst_21 = arith.constant 1.000000e+00 : f32
    %30 = vector.broadcast %cst_21 : f32 to vector<32x128xf32>
    %31 = arith.addf %30, %29 : vector<32x128xf32>
    %32 = tpu.reciprocal %31 {approx = true} : vector<32x128xf32> -> vector<32x128xf32>
    %33 = arith.mulf %26, %32 : vector<32x128xf32>
    %34 = arith.addf %5, %33 : vector<32x128xf32>
    %c2 = arith.constant 2 : index
    %c0_22 = arith.constant 0 : index
    %c0_23 = arith.constant 0 : index
    %35 = vector.load %arg4[%c2, %c0_22, %c0_23] : memref<6x32x32xf32, #tpu.memory_space<vmem>>, vector<1x32x32xf32>
    %36 = vector.shape_cast %35 : vector<1x32x32xf32> to vector<32x32xf32>
    %c2_24 = arith.constant 2 : index
    %c0_25 = arith.constant 0 : index
    %c0_26 = arith.constant 0 : index
    %37 = vector.load %arg5[%c2_24, %c0_25, %c0_26] : memref<6x32x1xf32, #tpu.memory_space<vmem>>, vector<1x32x1xf32>
    %38 = vector.shape_cast %37 : vector<1x32x1xf32> to vector<32x1xf32>
    %cst_27 = arith.constant dense<0.000000e+00> : vector<32x128xf32>
    %39 = tpu.matmul %36, %34, %cst_27 {dimension_numbers = #tpu.dot_dimension_numbers<[1], [0], [0], [1], [0, 0, 1, 1], [], []>} : vector<32x32xf32>, vector<32x128xf32>, vector<32x128xf32> -> vector<32x128xf32>
    %40 = vector.broadcast %38 : vector<32x1xf32> to vector<32x128xf32>
    %41 = arith.addf %39, %40 : vector<32x128xf32>
    %cst_28 = arith.constant 0.000000e+00 : f32
    %42 = vector.broadcast %cst_28 : f32 to vector<32x128xf32>
    %43 = arith.subf %42, %41 : vector<32x128xf32>
    %44 = math.exp %43 : vector<32x128xf32>
    %cst_29 = arith.constant 1.000000e+00 : f32
    %45 = vector.broadcast %cst_29 : f32 to vector<32x128xf32>
    %46 = arith.addf %45, %44 : vector<32x128xf32>
    %47 = tpu.reciprocal %46 {approx = true} : vector<32x128xf32> -> vector<32x128xf32>
    %48 = arith.mulf %41, %47 : vector<32x128xf32>
    %c3 = arith.constant 3 : index
    %c0_30 = arith.constant 0 : index
    %c0_31 = arith.constant 0 : index
    %49 = vector.load %arg4[%c3, %c0_30, %c0_31] : memref<6x32x32xf32, #tpu.memory_space<vmem>>, vector<1x32x32xf32>
    %50 = vector.shape_cast %49 : vector<1x32x32xf32> to vector<32x32xf32>
    %c3_32 = arith.constant 3 : index
    %c0_33 = arith.constant 0 : index
    %c0_34 = arith.constant 0 : index
    %51 = vector.load %arg5[%c3_32, %c0_33, %c0_34] : memref<6x32x1xf32, #tpu.memory_space<vmem>>, vector<1x32x1xf32>
    %52 = vector.shape_cast %51 : vector<1x32x1xf32> to vector<32x1xf32>
    %cst_35 = arith.constant dense<0.000000e+00> : vector<32x128xf32>
    %53 = tpu.matmul %50, %48, %cst_35 {dimension_numbers = #tpu.dot_dimension_numbers<[1], [0], [0], [1], [0, 0, 1, 1], [], []>} : vector<32x32xf32>, vector<32x128xf32>, vector<32x128xf32> -> vector<32x128xf32>
    %54 = vector.broadcast %52 : vector<32x1xf32> to vector<32x128xf32>
    %55 = arith.addf %53, %54 : vector<32x128xf32>
    %cst_36 = arith.constant 0.000000e+00 : f32
    %56 = vector.broadcast %cst_36 : f32 to vector<32x128xf32>
    %57 = arith.subf %56, %55 : vector<32x128xf32>
    %58 = math.exp %57 : vector<32x128xf32>
    %cst_37 = arith.constant 1.000000e+00 : f32
    %59 = vector.broadcast %cst_37 : f32 to vector<32x128xf32>
    %60 = arith.addf %59, %58 : vector<32x128xf32>
    %61 = tpu.reciprocal %60 {approx = true} : vector<32x128xf32> -> vector<32x128xf32>
    %62 = arith.mulf %55, %61 : vector<32x128xf32>
    %63 = arith.addf %34, %62 : vector<32x128xf32>
    %c4 = arith.constant 4 : index
    %c0_38 = arith.constant 0 : index
    %c0_39 = arith.constant 0 : index
    %64 = vector.load %arg4[%c4, %c0_38, %c0_39] : memref<6x32x32xf32, #tpu.memory_space<vmem>>, vector<1x32x32xf32>
    %65 = vector.shape_cast %64 : vector<1x32x32xf32> to vector<32x32xf32>
    %c4_40 = arith.constant 4 : index
    %c0_41 = arith.constant 0 : index
    %c0_42 = arith.constant 0 : index
    %66 = vector.load %arg5[%c4_40, %c0_41, %c0_42] : memref<6x32x1xf32, #tpu.memory_space<vmem>>, vector<1x32x1xf32>
    %67 = vector.shape_cast %66 : vector<1x32x1xf32> to vector<32x1xf32>
    %cst_43 = arith.constant dense<0.000000e+00> : vector<32x128xf32>
    %68 = tpu.matmul %65, %63, %cst_43 {dimension_numbers = #tpu.dot_dimension_numbers<[1], [0], [0], [1], [0, 0, 1, 1], [], []>} : vector<32x32xf32>, vector<32x128xf32>, vector<32x128xf32> -> vector<32x128xf32>
    %69 = vector.broadcast %67 : vector<32x1xf32> to vector<32x128xf32>
    %70 = arith.addf %68, %69 : vector<32x128xf32>
    %cst_44 = arith.constant 0.000000e+00 : f32
    %71 = vector.broadcast %cst_44 : f32 to vector<32x128xf32>
    %72 = arith.subf %71, %70 : vector<32x128xf32>
    %73 = math.exp %72 : vector<32x128xf32>
    %cst_45 = arith.constant 1.000000e+00 : f32
    %74 = vector.broadcast %cst_45 : f32 to vector<32x128xf32>
    %75 = arith.addf %74, %73 : vector<32x128xf32>
    %76 = tpu.reciprocal %75 {approx = true} : vector<32x128xf32> -> vector<32x128xf32>
    %77 = arith.mulf %70, %76 : vector<32x128xf32>
    %c5 = arith.constant 5 : index
    %c0_46 = arith.constant 0 : index
    %c0_47 = arith.constant 0 : index
    %78 = vector.load %arg4[%c5, %c0_46, %c0_47] : memref<6x32x32xf32, #tpu.memory_space<vmem>>, vector<1x32x32xf32>
    %79 = vector.shape_cast %78 : vector<1x32x32xf32> to vector<32x32xf32>
    %c5_48 = arith.constant 5 : index
    %c0_49 = arith.constant 0 : index
    %c0_50 = arith.constant 0 : index
    %80 = vector.load %arg5[%c5_48, %c0_49, %c0_50] : memref<6x32x1xf32, #tpu.memory_space<vmem>>, vector<1x32x1xf32>
    %81 = vector.shape_cast %80 : vector<1x32x1xf32> to vector<32x1xf32>
    %cst_51 = arith.constant dense<0.000000e+00> : vector<32x128xf32>
    %82 = tpu.matmul %79, %77, %cst_51 {dimension_numbers = #tpu.dot_dimension_numbers<[1], [0], [0], [1], [0, 0, 1, 1], [], []>} : vector<32x32xf32>, vector<32x128xf32>, vector<32x128xf32> -> vector<32x128xf32>
    %83 = vector.broadcast %81 : vector<32x1xf32> to vector<32x128xf32>
    %84 = arith.addf %82, %83 : vector<32x128xf32>
    %cst_52 = arith.constant 0.000000e+00 : f32
    %85 = vector.broadcast %cst_52 : f32 to vector<32x128xf32>
    %86 = arith.subf %85, %84 : vector<32x128xf32>
    %87 = math.exp %86 : vector<32x128xf32>
    %cst_53 = arith.constant 1.000000e+00 : f32
    %88 = vector.broadcast %cst_53 : f32 to vector<32x128xf32>
    %89 = arith.addf %88, %87 : vector<32x128xf32>
    %90 = tpu.reciprocal %89 {approx = true} : vector<32x128xf32> -> vector<32x128xf32>
    %91 = arith.mulf %84, %90 : vector<32x128xf32>
    %92 = arith.addf %63, %91 : vector<32x128xf32>
    %c0_54 = arith.constant 0 : index
    %c0_55 = arith.constant 0 : index
    %93 = vector.load %arg6[%c0_54, %c0_55] : memref<1x32xf32, #tpu.memory_space<vmem>>, vector<1x32xf32>
    %c0_56 = arith.constant 0 : index
    %c0_57 = arith.constant 0 : index
    %94 = vector.load %arg7[%c0_56, %c0_57] : memref<1x1xf32, #tpu.memory_space<vmem>>, vector<1x1xf32>
    %cst_58 = arith.constant dense<0.000000e+00> : vector<1x128xf32>
    %95 = tpu.matmul %93, %92, %cst_58 {dimension_numbers = #tpu.dot_dimension_numbers<[1], [0], [0], [1], [0, 0, 1, 1], [], []>} : vector<1x32xf32>, vector<32x128xf32>, vector<1x128xf32> -> vector<1x128xf32>
    %96 = vector.broadcast %94 : vector<1x1xf32> to vector<1x128xf32>
    %97 = arith.addf %95, %96 : vector<1x128xf32>
    %c0_59 = arith.constant 0 : index
    %c0_60 = arith.constant 0 : index
    %98 = vector.load %arg8[%c0_59, %c0_60] : memref<1x128xf32, #tpu.memory_space<vmem>>, vector<1x128xf32>
    tpu.vector_store %arg8[%c0_59, %c0_60], %97 {strides = array<i32>} : memref<1x128xf32, #tpu.memory_space<vmem>>, vector<1x128xf32>,
    return
  }
  func.func @transform_0(%arg0: i32) -> (i32, i32) {
    %c0_i32 = arith.constant 0 : i32
    %c0_i32_0 = arith.constant 0 : i32
    return %c0_i32, %arg0 : i32, i32
  }
  func.func @transform_1(%arg0: i32) -> (i32, i32) {
    %c0_i32 = arith.constant 0 : i32
    %c0_i32_0 = arith.constant 0 : i32
    %c0_i32_1 = arith.constant 0 : i32
    return %c0_i32, %c0_i32_0 : i32, i32
  }
  func.func @transform_2(%arg0: i32) -> (i32, i32) {
    %c0_i32 = arith.constant 0 : i32
    %c0_i32_0 = arith.constant 0 : i32
    %c0_i32_1 = arith.constant 0 : i32
    return %c0_i32, %c0_i32_0 : i32, i32
  }
  func.func @transform_3(%arg0: i32) -> (i32, i32, i32) {
    %c0_i32 = arith.constant 0 : i32
    %c0_i32_0 = arith.constant 0 : i32
    %c0_i32_1 = arith.constant 0 : i32
    %c0_i32_2 = arith.constant 0 : i32
    return %c0_i32, %c0_i32_0, %c0_i32_1 : i32, i32, i32
  }
  func.func @transform_4(%arg0: i32) -> (i32, i32, i32) {
    %c0_i32 = arith.constant 0 : i32
    %c0_i32_0 = arith.constant 0 : i32
    %c0_i32_1 = arith.constant 0 : i32
    %c0_i32_2 = arith.constant 0 : i32
    return %c0_i32, %c0_i32_0, %c0_i32_1 : i32, i32, i32
  }
  func.func @transform_5(%arg0: i32) -> (i32, i32) {
    %c0_i32 = arith.constant 0 : i32
    %c0_i32_0 = arith.constant 0 : i32
    %c0_i32_1 = arith.constant 0 : i32
    return %c0_i32, %c0_i32_0 : i32, i32
  }
  func.func @transform_6(%arg0: i32) -> (i32, i32) {
    %c0_i32 = arith.constant 0 : i32
    %c0_i32_0 = arith.constant 0 : i32
    %c0_i32_1 = arith.constant 0 : i32
    return %c0_i32, %c0_i32_0 : i32, i32
  }
  func.func @transform_7(%arg0: i32) -> (i32, i32) {
    %c0_i32 = arith.constant 0 : i32
    %c0_i32_0 = arith.constant 0 : i32
    return %c0_i32, %arg0 : i32, i32
  }
}

</mosaic_0001>

<bundles_post_ra>
// kernel: _net_forward_impl.1
= control target key start
LH: loop header
LB: loop body
LE: loop exit
PB: predicated region body
PF: predicated region fallthrough
CT: control target
= control target key end

     0   :  { %s2317_s0 = inlined_call_operand.vmem [shape: f32[4,256], index: 0, kind: input, shape index: {}]   ;;  %s2318_s1 = inlined_call_operand.vmem [shape: f32[32,4], index: 1, kind: input, shape index: {}]   ;;  %s2319_s2 = inlined_call_operand.vmem [shape: f32[32,1], index: 2, kind: input, shape index: {}]   ;;  %s2320_s3 = inlined_call_operand.vmem [shape: f32[6,32,32], index: 3, kind: input, shape index: {}]   ;;  %s2321_s4 = inlined_call_operand.vmem [shape: f32[6,32,1], index: 4, kind: input, shape index: {}]   ;;  %s2322_s5 = inlined_call_operand.vmem [shape: f32[1,32], index: 5, kind: input, shape index: {}]   ;;  %s2323_s6 = inlined_call_operand.<no memory space> [shape: f32[1,1], index: 6, kind: input, shape index: {}]   ;;  %s2324_s7 = inlined_call_operand.hbm [shape: f32[1,256], index: 7, kind: output, shape index: {}]  }
   0x1   :  { %v12_v0 = vstv %s2323_s6 }
   0x2   :  { %13 = vst [vmem:[#allocation2] sm:$0x1] %v12_v0 }
   0x3   :  { %14 = vsyncpa [#allocation4], 0 }
   0x4   :  { %16 = vsyncpa [#allocation4 + $0x1], 0  ;;  %s1964_s26 = smov 0   ;;  %s1966_s27 = smov 0  }
   0x5   :  { %s1968_s28 = smov 0   ;;  %s1970_s29 = smov 0  }
   0x6 LB: > { %s1985_s6 = sadd.s32 4294967295, %s1915_s29   ;;  %s1476_s30 = sadd.s32 4294967294, %s1915_s29   ;;  %s1915_s29 = sphi %s1970_s29, %s2330_s29   ;;  %s1911_s28 = sphi %s1968_s28, %s2329_s28   ;;  %s1907_s27 = sphi %s1966_s27, %s2328_s27   ;;  %s1903_s26 = sphi %s1964_s26, %s2327_s26  }
   0x7   : > { %s1989_s8 = sadd.s32 1, %s1915_s29   ;;  %s181_s9 = sadd.s32 1, %s1911_s28 }
   0x8   : > { %s178_s10 = ssub.s32 %s1915_s29, %s1989_s8  ;;  %p191_p0 = scmp.ne.s32.totalorder %s1911_s28, %s1907_s27 }
   0x9   : > { %p179_p1 = scmp.eq.s32.totalorder %s178_s10, 0  ;;  %p192_p2 = scmp.eq.s32.totalorder %s1985_s6, 1 }
   0xa   : > { %p197_p3 = scmp.ne.s32.totalorder %s1907_s27, %s1903_s26  ;;  %p198_p4 = scmp.eq.s32.totalorder %s1476_s30, 1 }
   0xb   : > { %s2000_s11 = scalar_select %p179_p1, %s1911_s28, %s181_s9  }
   0xc   : > { %p2002_p5 = por %p192_p2, %p191_p0  ;;  %p2006_p6 = por %p198_p4, %p197_p3 }
   0xd   : > { %p1479_p7 = scmp.ge.s32.totalorder %s1915_s29, 1  ;;  %p241_p8 = scmp.lt.s32.totalorder %s1915_s29, 3 }
   0xf   : > { %p242_p9 = pnand %p1479_p7, %p241_p8 }
  0x10   : > { %p271_p10 = scmp.lt.s32.totalorder (!%p242_p9), %s1985_s6, 1  ;;  %s269_s10 = sand.u32 (!%p242_p9), 1, %s1907_s27  }
  0x11   : > { %245 = sbr.rel (%p242_p9) target bundleno = 1907 (0x773), region = 48  ;;  %s1551_s14 = sshll.u32 (!%p242_p9), %s1985_s6, 4 }
  0x12   : > { %s270_s15 = scalar_lea.vmem (!%p242_p9), [#allocation3], %s269_s10  ;;  %s2282_s19 = scalar_lea.hbm (!%p242_p9), %s2324_s7, %s1551_s14 }
  0x13   : > { %s1421_s16 = sshll.u32 (!%p242_p9), %s270_s15, 4  ;;  %s1409_s20 = scalar_lea.sflag (!%p242_p9), [#allocation4], %s269_s10  ;;  %s1422_s16 = int_to_ptr.vmem [resolvable:$true] %s1421_s16 }
  0x16   : > { %v276_v1 = vld [vmem:[%s2318_s1] sm:$0xff]  ;;  %vm304_vm0 = vcmask 31744   ;;  %v283_v2 = vld [vmem:[%s2319_s2 + $0x18] sm:$0xff]  ;;  %s272_s18 = scalar_select %p271_p10, %s1985_s6, 1  ;;  %v1917_v3 = vmov 0   ;;  %v281_v4 = vld [vmem:[%s2319_s2 + $0x8] sm:$0xff] }
  0x17   : > { %1614 = vmatprep.mubr.msk.f32.mxu0 %vm304_vm0, %v276_v1  ;;  %1757 = vset.pattern.permute.xlu0 %v1917_v3  ;;  %vm317_vm1 = vcmask 1043456   ;;  %v282_v5 = vld [vmem:[%s2319_s2 + $0x10] sm:$0xff]  ;;  %v280_v6 = vld [vmem:[%s2319_s2] sm:$0xff]  ;;  %v277_v8 = vld [vmem:[%s2318_s1 + $0x8] sm:$0xff]  ;;  %vm434_vm2 = vcmask 261120   ;;  %vm1919_vm3 = vmmov 0  }
  0x18   : > { %1758 = vset.pattern.permute.xlu1 %v1917_v3  ;;  %301 = vperm.xlu0 %1757, %v283_v2   ;;  %s1480_s21 = sshll.u32 %s272_s18, 2  ;;  %v278_v9 = vld [vmem:[%s2318_s1 + $0x10] sm:$0xff]  ;;  %v413_v10 = vld [vmem:[%s2321_s4 + $0x18] sm:$0xff]  ;;  %v411_v13 = vld [vmem:[%s2321_s4 + $0x8] sm:$0xff]  ;;  %s1920_s6 = smov [#allocation3]  }
  0x19   : > { %291 = vperm.xlu1 %1758, %v281_v4   ;;  %s274_s30 = scalar_lea.vmem %s2317_s0, %s1480_s21  ;;  %v412_v11 = vld [vmem:[%s2321_s4 + $0x10] sm:$0xff]  ;;  %v279_v12 = vld [vmem:[%s2318_s1 + $0x18] sm:$0xff]  ;;  %v410_v14 = vld [vmem:[%s2321_s4] sm:$0xff]  ;;  %s1855_s21 = scalar_lea.vmem %s1422_s16, 16 }
  0x1a   : > { %v275_v7 = vld [vmem:[%s274_s30] sm:$0xf]  ;;  %v1497_v15 = vld [vmem:[%s2321_s4 + $0x38] sm:$0xff]  ;;  %v1496_v16 = vld [vmem:[%s2321_s4 + $0x30] sm:$0xff]  ;;  %p1856_p11 = scmp.ne.s32.totalorder %s1422_s16, %s1855_s21  ;;  %s1859_s22 = sshll.u32 %s1920_s6, 4  ;;  %s1860_s22 = int_to_ptr.vmem [resolvable:$false] %s1859_s22 }
  0x1b   : > { %1612 = vmatprep.subr.msk.mxu0 %vm317_vm1, %v275_v7  ;;  %v1495_v17 = vld [vmem:[%s2321_s4 + $0x28] sm:$0xff]  ;;  %v1494_v18 = vld [vmem:[%s2321_s4 + $0x20] sm:$0xff]  ;;  %v1509_v19 = vld [vmem:[%s2321_s4 + $0x58] sm:$0xff]  ;;  %s1861_s23 = scalar_lea.vmem %s1860_s22, 32  ;;  %p1862_p0 = scmp.lt.s32.totalorder %s1422_s16, %s1860_s22 }
  0x1c   : > { %296 = vperm.xlu0 %1757, %v282_v5   ;;  %1613 = vmatpush3.msk.msra.mxu0 %vm317_vm1, %v275_v7  ;;  %v1508_v20 = vld [vmem:[%s2321_s4 + $0x50] sm:$0xff]  ;;  %v1507_v21 = vld [vmem:[%s2321_s4 + $0x48] sm:$0xff]  ;;  %v1506_v22 = vld [vmem:[%s2321_s4 + $0x40] sm:$0xff]  ;;  %p1857_p12 = pnand %p1856_p11, %p2002_p5  ;;  %p1863_p1 = scmp.lt.s32.totalorder %s1861_s23, %s1855_s21 }
  0x1d   : > { %286 = vperm.xlu1 %1758, %v280_v6   ;;  %1615 = vmatmul.mubr.msk.f32.vlgmr.msra.gmra.mxu0 %vm304_vm0, %v277_v8  ;;  %v1521_v23 = vld [vmem:[%s2321_s4 + $0x78] sm:$0xff]  ;;  %v1520_v24 = vld [vmem:[%s2321_s4 + $0x70] sm:$0xff]  ;;  %v1519_v25 = vld [vmem:[%s2321_s4 + $0x68] sm:$0xff] }
  0x1e   : > { %1617 = vmatprep.mubr.msk.f32.mxu0 %vm304_vm0, %v278_v9  ;;  %v1518_v26 = vld [vmem:[%s2321_s4 + $0x60] sm:$0xff]  ;;  %v1533_v27 = vld [vmem:[%s2321_s4 + $0x98] sm:$0xff]  ;;  %v1532_v28 = vld [vmem:[%s2321_s4 + $0x90] sm:$0xff]  ;;  %p1858_p13 = pneg %p1857_p12  ;;  %p1864_p2 = por %p1863_p1, %p1862_p0 }
  0x1f   : > { %v1531_v29 = vld [vmem:[%s2321_s4 + $0x88] sm:$0xff]  ;;  %v1530_v30 = vld [vmem:[%s2321_s4 + $0x80] sm:$0xff]  ;;  %v1545_v31 = vld [vmem:[%s2321_s4 + $0xb8] sm:$0xff] }
  0x20   : > { %431 = vperm.xlu0 %1757, %v413_v10   ;;  %v1544_v32 = vld [vmem:[%s2321_s4 + $0xb0] sm:$0xff]  ;;  %v1543_v33 = vld [vmem:[%s2321_s4 + $0xa8] sm:$0xff]  ;;  %v1542_v34 = vld [vmem:[%s2321_s4 + $0xa0] sm:$0xff]  ;;  %p1865_p3 = pnand %p1864_p2, %p1858_p13 }
  0x21   : > { %426 = vperm.xlu1 %1758, %v412_v11   ;;  %1618 = vmatmul.mubr.msk.f32.gmra.mxu0 %vm304_vm0, %v279_v12  ;;  %v1324_v35 = vld [vmem:[#allocation2] sm:$0x1]  ;;  %v407_v49 = vld [vmem:[%s2320_s3 + $0x8] sm:$0xff]  ;;  %v408_v50 = vld [vmem:[%s2320_s3 + $0x10] sm:$0xff] }
  0x22   : > { %v406_v36 = vld [vmem:[%s2320_s3] sm:$0xff]  ;;  %v409_v51 = vld [vmem:[%s2320_s3 + $0x18] sm:$0xff] }
  0x23   : > { %1628 = vmatprep.mubr.msk.f32.mxu1 %vm434_vm2, %v406_v36  ;;  %v1490_v52 = vld [vmem:[%s2320_s3 + $0x20] sm:$0xff] }
  0x24   : > { %421 = vperm.xlu0 %1757, %v411_v13   ;;  %1642 = vmatprep.mubr.msk.f32.mxu0 %vm434_vm2, %v1490_v52 }
  0x25   : > { %416 = vperm.xlu1 %1758, %v410_v14  }
  0x28   : > { %583 = vperm.xlu0 %1757, %v1497_v15  }
  0x29   : > { %578 = vperm.xlu1 %1758, %v1496_v16  }
  0x2c   : > { %573 = vperm.xlu0 %1757, %v1495_v17  }
  0x2d   : > { %568 = vperm.xlu1 %1758, %v1494_v18  }
  0x30   : > { %738 = vperm.xlu0 %1757, %v1509_v19  }
  0x31   : > { %733 = vperm.xlu1 %1758, %v1508_v20  }
  0x34   : > { %728 = vperm.xlu0 %1757, %v1507_v21  }
  0x35   : > { %723 = vperm.xlu1 %1758, %v1506_v22  }
  0x38   : > { %889 = vperm.xlu0 %1757, %v1521_v23  }
  0x39   : > { %884 = vperm.xlu1 %1758, %v1520_v24  }
  0x3c   : > { %879 = vperm.xlu0 %1757, %v1519_v25   ;;  %v1491_v25 = vld [vmem:[%s2320_s3 + $0x28] sm:$0xff] }
  0x3d   : > { %874 = vperm.xlu1 %1758, %v1518_v26   ;;  %v1492_v26 = vld [vmem:[%s2320_s3 + $0x30] sm:$0xff] }
  0x40   : > { %1044 = vperm.xlu0 %1757, %v1533_v27   ;;  %v1493_v27 = vld [vmem:[%s2320_s3 + $0x38] sm:$0xff] }
  0x41   : > { %1039 = vperm.xlu1 %1758, %v1532_v28   ;;  %v1502_v28 = vld [vmem:[%s2320_s3 + $0x40] sm:$0xff] }
  0x44   : > { %1034 = vperm.xlu0 %1757, %v1531_v29  }
  0x45   : > { %1029 = vperm.xlu1 %1758, %v1530_v30  }
  0x48   : > { %1195 = vperm.xlu0 %1757, %v1545_v31  }
  0x49   : > { %1190 = vperm.xlu1 %1758, %v1544_v32  }
  0x4c   : > { %1185 = vperm.xlu0 %1757, %v1543_v33  }
  0x4d   : > { %1180 = vperm.xlu1 %1758, %v1542_v34  }
  0x50   : > { %1327 = vperm.xlu0 %1757, %v1324_v35  }
  0x93   : > { %v302_v37 = vpop.permute.xlu0 %301 }
  0x94   : > { %v292_v40 = vpop.permute.xlu1 %291 }
  0x97   : > { %v297_v43 = vpop.permute.xlu0 %296 }
  0x98   : > { %v287_v47 = vpop.permute.xlu1 %286 }
  0x9b   : > { %v432_v53 = vpop.permute.xlu0 %431 }
  0x9c   : > { %v427_v54 = vpop.permute.xlu1 %426 }
  0x9f   : > { %v422_v55 = vpop.permute.xlu0 %421 }
  0xa0   : > { %v417_v58 = vpop.permute.xlu1 %416 }
  0xa3   : > { %v584_v29 = vpop.permute.xlu0 %583 }
  0xa4   : > { %v579_v30 = vpop.permute.xlu1 %578 }
  0xa7   : > { %v574_v31 = vpop.permute.xlu0 %573 }
  0xa8   : > { %v569_v34 = vpop.permute.xlu1 %568 }
  0xdd   : > { %v1616_v38 = vpop.f32.mrf.mxu0 }
  0xde   : > { %v2127_v46 = vadd.f32 %v1616_v38, %v292_v40 }
  0xdf   : > { %v387_v39 = vpop.f32.mrf.mxu0 }
  0xe0   : > { %v2131_v48 = vadd.f32 %v387_v39, %v287_v47 }
  0xe1   : > { %v1619_v41 = vpop.f32.mrf.mxu0 }
  0xe2   : > { %v2121_v42 = vadd.f32 %v1619_v41, %v302_v37 }
  0xe3   : > { %v397_v44 = vpop.f32.mrf.mxu0 }
  0xe4   : > { %v2123_v45 = vadd.f32 %v397_v44, %v297_v43  ;;  %1620 = vmatprep.subr.mxu1 %v2121_v42 }
  0xe5   : > { %1621 = vmatpush3.msra.mxu1 %v2121_v42 }
  0xe6   : > { %1622 = vmatprep.subr.mxu1 %v2123_v45 }
  0xe7   : > { %1623 = vmatpush3.msra.mxu1 %v2123_v45 }
  0xe8   : > { %1624 = vmatprep.subr.mxu1 %v2127_v46 }
  0xe9   : > { %1625 = vmatpush3.msra.mxu1 %v2127_v46 }
  0xea   : > { %1626 = vmatprep.subr.mxu1 %v2131_v48 }
  0xeb   : > { %1627 = vmatpush3.msra.mxu1 %v2131_v48 }
  0xec   : > { %1629 = vmatmul.mubr.msk.f32.vlgmr.msra.gmra.mxu1 %vm434_vm2, %v407_v49 }
  0xed   : > { %1631 = vmatprep.mubr.msk.f32.mxu1 %vm434_vm2, %v408_v50 }
  0xf0   : > { %1632 = vmatmul.mubr.msk.f32.gmra.mxu1 %vm434_vm2, %v409_v51 }
  0xf1   : > { %1656 = vmatprep.mubr.msk.f32.mxu1 %vm434_vm2, %v1502_v28 }
 0x1ac   : > { %v1630_v56 = vpop.f32.mrf.mxu1 }
 0x1ad   : > { %v519_v57 = vadd.f32 %v1630_v56, %v422_v55 }
 0x1ae   : > { %v513_v59 = vpop.f32.mrf.mxu1 }
 0x1af   : > { %v533_v60 = vsub.f32 0.0, %v519_v57  ;;  %v514_v61 = vadd.f32 %v513_v59, %v417_v58 }
 0x1b0   : > { %v1633_v62 = vpop.f32.mrf.mxu1 }
 0x1b1   : > { %v538_v63 = vmul.f32 1.442695, %v533_v60  ;;  %v532_v0 = vsub.f32 0.0, %v514_v61  ;;  %v529_v1 = vadd.f32 %v1633_v62, %v432_v53 }
 0x1b2   : > { %v523_v2 = vpop.f32.mrf.mxu1 }
 0x1b3   : > { %v536_v3 = vmul.f32 1.442695, %v532_v0  ;;  %v535_v4 = vsub.f32 0.0, %v529_v1  ;;  %v524_v5 = vadd.f32 %v523_v2, %v427_v54  ;;  %1759 = vpow2.f32 %v538_v63 }
 0x1b5   : > { %v542_v6 = vmul.f32 1.442695, %v535_v4  ;;  %v534_v7 = vsub.f32 0.0, %v524_v5  ;;  %1761 = vpow2.f32 %v536_v3 }
 0x1b7   : > { %1763 = vpow2.f32 %v542_v6  ;;  %v540_v8 = vmul.f32 1.442695, %v534_v7 }
 0x1b9   : > { %1765 = vpow2.f32 %v540_v8  ;;  %v1514_v8 = vld [vmem:[%s2320_s3 + $0x60] sm:$0xff] }
 0x1c0   : > { %v1760_v9 = vpop.eup %1759 }
 0x1c1   : > { %v545_v12 = vadd.f32 1.0, %v1760_v9  ;;  %v739_v9 = vpop.permute.xlu0 %738 }
 0x1c2   : > { %v1762_v10 = vpop.eup %1761 }
 0x1c3   : > { %v544_v15 = vadd.f32 1.0, %v1762_v10  ;;  %v734_v10 = vpop.permute.xlu1 %733 }
 0x1c4   : > { %v1764_v11 = vpop.eup %1763 }
 0x1c5   : > { %v547_v13 = vadd.f32 1.0, %v1764_v11  ;;  %v729_v11 = vpop.permute.xlu0 %728 }
 0x1c6   : > { %v1766_v14 = vpop.eup %1765 }
 0x1c7   : > { %1767 = vrcp.f32 %v547_v13  ;;  %v546_v16 = vadd.f32 1.0, %v1766_v14  ;;  %v724_v14 = vpop.permute.xlu1 %723 }
 0x1c8   : > { %1769 = vrcp.f32 %v545_v12 }
 0x1c9   : > { %1771 = vrcp.f32 %v546_v16 }
 0x1ca   : > { %1773 = vrcp.f32 %v544_v15 }
 0x1d4   : > { %v1768_v17 = vpop.eup %1767 }
 0x1d5   : > { %v1770_v18 = vpop.eup %1769  ;;  %v555_v19 = vmul.f32 %v1768_v17, %v529_v1 }
 0x1d6   : > { %v1772_v20 = vpop.eup %1771  ;;  %v553_v23 = vmul.f32 %v1770_v18, %v519_v57 }
 0x1d7   : > { %v554_v21 = vmul.f32 %v1772_v20, %v524_v5  ;;  %1634 = vmatprep.subr.mxu0 %v555_v19  ;;  %v1774_v22 = vpop.eup %1773 }
 0x1d8   : > { %1635 = vmatpush3.msra.mxu0 %v555_v19  ;;  %v552_v24 = vmul.f32 %v1774_v22, %v514_v61 }
 0x1d9   : > { %1636 = vmatprep.subr.mxu0 %v554_v21 }
 0x1da   : > { %1637 = vmatpush3.msra.mxu0 %v554_v21 }
 0x1db   : > { %1638 = vmatprep.subr.mxu0 %v553_v23 }
 0x1dc   : > { %1639 = vmatpush3.msra.mxu0 %v553_v23 }
 0x1dd   : > { %1640 = vmatprep.subr.mxu0 %v552_v24 }
 0x1de   : > { %1641 = vmatpush3.msra.mxu0 %v552_v24 }
 0x1df   : > { %1643 = vmatmul.mubr.msk.f32.vlgmr.msra.gmra.mxu0 %vm434_vm2, %v1491_v25 }
 0x1e0   : > { %1645 = vmatprep.mubr.msk.f32.mxu0 %vm434_vm2, %v1492_v26 }
 0x1e3   : > { %1646 = vmatmul.mubr.msk.f32.gmra.mxu0 %vm434_vm2, %v1493_v27 }
 0x1e4   : > { %1670 = vmatprep.mubr.msk.f32.mxu0 %vm434_vm2, %v1514_v8 }
 0x29f   : > { %v1644_v32 = vpop.f32.mrf.mxu0 }
 0x2a0   : > { %v670_v33 = vadd.f32 %v1644_v32, %v574_v31 }
 0x2a1   : > { %v664_v35 = vpop.f32.mrf.mxu0 }
 0x2a2   : > { %v684_v36 = vsub.f32 0.0, %v670_v33  ;;  %v665_v37 = vadd.f32 %v664_v35, %v569_v34 }
 0x2a3   : > { %v1647_v38 = vpop.f32.mrf.mxu0 }
 0x2a4   : > { %v689_v39 = vmul.f32 1.442695, %v684_v36  ;;  %v683_v40 = vsub.f32 0.0, %v665_v37  ;;  %v680_v41 = vadd.f32 %v1647_v38, %v584_v29 }
 0x2a5   : > { %v674_v43 = vpop.f32.mrf.mxu0 }
 0x2a6   : > { %1775 = vpow2.f32 %v689_v39  ;;  %v687_v44 = vmul.f32 1.442695, %v683_v40  ;;  %v686_v47 = vsub.f32 0.0, %v680_v41  ;;  %v675_v49 = vadd.f32 %v674_v43, %v579_v30 }
 0x2a8   : > { %1777 = vpow2.f32 %v687_v44  ;;  %v693_v50 = vmul.f32 1.442695, %v686_v47  ;;  %v685_v51 = vsub.f32 0.0, %v675_v49 }
 0x2aa   : > { %1779 = vpow2.f32 %v693_v50  ;;  %v691_v52 = vmul.f32 1.442695, %v685_v51  ;;  %v1516_v50 = vld [vmem:[%s2320_s3 + $0x70] sm:$0xff]  ;;  %v1517_v51 = vld [vmem:[%s2320_s3 + $0x78] sm:$0xff] }
 0x2ac   : > { %1781 = vpow2.f32 %v691_v52  ;;  %v1526_v52 = vld [vmem:[%s2320_s3 + $0x80] sm:$0xff] }
 0x2b3   : > { %v1776_v53 = vpop.eup %1775 }
 0x2b4   : > { %v696_v55 = vadd.f32 1.0, %v1776_v53  ;;  %v890_v53 = vpop.permute.xlu0 %889 }
 0x2b5   : > { %v1778_v54 = vpop.eup %1777 }
 0x2b6   : > { %v695_v57 = vadd.f32 1.0, %v1778_v54  ;;  %1783 = vrcp.f32 %v696_v55  ;;  %v885_v54 = vpop.permute.xlu1 %884 }
 0x2b7   : > { %v1780_v56 = vpop.eup %1779 }
 0x2b8   : > { %v698_v58 = vadd.f32 1.0, %v1780_v56  ;;  %v880_v55 = vpop.permute.xlu0 %879 }
 0x2b9   : > { %v1782_v59 = vpop.eup %1781 }
 0x2ba   : > { %1785 = vrcp.f32 %v698_v58  ;;  %v697_v60 = vadd.f32 1.0, %v1782_v59  ;;  %v875_v58 = vpop.permute.xlu1 %874 }
 0x2bb   : > { %1787 = vrcp.f32 %v695_v57 }
 0x2bc   : > { %1789 = vrcp.f32 %v697_v60 }
 0x2c3   : > { %v1784_v61 = vpop.eup %1783 }
 0x2c4   : > { %v704_v2 = vmul.f32 %v1784_v61, %v670_v33 }
 0x2c6   : > { %v2179_v7 = vadd.f32 %v704_v2, %v2127_v46  ;;  %v1504_v46 = vld [vmem:[%s2320_s3 + $0x50] sm:$0xff] }
 0x2c7   : > { %v1786_v62 = vpop.eup %1785 }
 0x2c8   : > { %v1788_v63 = vpop.eup %1787  ;;  %v706_v0 = vmul.f32 %v1786_v62, %v680_v41 }
 0x2c9   : > { %v1790_v1 = vpop.eup %1789  ;;  %v703_v5 = vmul.f32 %v1788_v63, %v665_v37 }
 0x2ca   : > { %v705_v3 = vmul.f32 %v1790_v1, %v675_v49  ;;  %v2170_v4 = vadd.f32 %v706_v0, %v2121_v42  ;;  %v1515_v49 = vld [vmem:[%s2320_s3 + $0x68] sm:$0xff] }
 0x2cb   : > { %v2184_v42 = vadd.f32 %v703_v5, %v2131_v48  ;;  %v1505_v48 = vld [vmem:[%s2320_s3 + $0x58] sm:$0xff] }
 0x2cc   : > { %1648 = vmatprep.subr.mxu1 %v2170_v4  ;;  %v2174_v6 = vadd.f32 %v705_v3, %v2123_v45  ;;  %v1503_v45 = vld [vmem:[%s2320_s3 + $0x48] sm:$0xff] }
 0x2cd   : > { %1649 = vmatpush3.msra.mxu1 %v2170_v4 }
 0x2ce   : > { %1650 = vmatprep.subr.mxu1 %v2174_v6 }
 0x2cf   : > { %1651 = vmatpush3.msra.mxu1 %v2174_v6 }
 0x2d0   : > { %1652 = vmatprep.subr.mxu1 %v2179_v7 }
 0x2d1   : > { %1653 = vmatpush3.msra.mxu1 %v2179_v7 }
 0x2d2   : > { %1654 = vmatprep.subr.mxu1 %v2184_v42 }
 0x2d3   : > { %1655 = vmatpush3.msra.mxu1 %v2184_v42 }
 0x2d4   : > { %1657 = vmatmul.mubr.msk.f32.vlgmr.msra.gmra.mxu1 %vm434_vm2, %v1503_v45 }
 0x2d5   : > { %1659 = vmatprep.mubr.msk.f32.mxu1 %vm434_vm2, %v1504_v46 }
 0x2d8   : > { %1660 = vmatmul.mubr.msk.f32.gmra.mxu1 %vm434_vm2, %v1505_v48 }
 0x2d9   : > { %1684 = vmatprep.mubr.msk.f32.mxu1 %vm434_vm2, %v1526_v52 }
 0x394   : > { %v1658_v12 = vpop.f32.mrf.mxu1 }
 0x395   : > { %v825_v13 = vadd.f32 %v1658_v12, %v729_v11 }
 0x396   : > { %v819_v15 = vpop.f32.mrf.mxu1 }
 0x397   : > { %v839_v16 = vsub.f32 0.0, %v825_v13  ;;  %v820_v17 = vadd.f32 %v819_v15, %v724_v14 }
 0x398   : > { %v1661_v18 = vpop.f32.mrf.mxu1 }
 0x399   : > { %v844_v19 = vmul.f32 1.442695, %v839_v16  ;;  %v838_v20 = vsub.f32 0.0, %v820_v17  ;;  %v835_v21 = vadd.f32 %v1661_v18, %v739_v9 }
 0x39a   : > { %v829_v22 = vpop.f32.mrf.mxu1 }
 0x39b   : > { %v842_v23 = vmul.f32 1.442695, %v838_v20  ;;  %v841_v24 = vsub.f32 0.0, %v835_v21  ;;  %v830_v25 = vadd.f32 %v829_v22, %v734_v10  ;;  %1791 = vpow2.f32 %v844_v19 }
 0x39d   : > { %v848_v26 = vmul.f32 1.442695, %v841_v24  ;;  %v840_v27 = vsub.f32 0.0, %v830_v25  ;;  %1793 = vpow2.f32 %v842_v23 }
 0x39f   : > { %1795 = vpow2.f32 %v848_v26  ;;  %v846_v28 = vmul.f32 1.442695, %v840_v27 }
 0x3a1   : > { %1797 = vpow2.f32 %v846_v28  ;;  %v1538_v28 = vld [vmem:[%s2320_s3 + $0xa0] sm:$0xff] }
 0x3a8   : > { %v1792_v29 = vpop.eup %1791 }
 0x3a9   : > { %v851_v32 = vadd.f32 1.0, %v1792_v29  ;;  %v1045_v29 = vpop.permute.xlu0 %1044 }
 0x3aa   : > { %v1794_v30 = vpop.eup %1793 }
 0x3ab   : > { %v850_v35 = vadd.f32 1.0, %v1794_v30  ;;  %v1040_v30 = vpop.permute.xlu1 %1039 }
 0x3ac   : > { %v1796_v31 = vpop.eup %1795 }
 0x3ad   : > { %v853_v33 = vadd.f32 1.0, %v1796_v31  ;;  %v1035_v31 = vpop.permute.xlu0 %1034 }
 0x3ae   : > { %v1798_v34 = vpop.eup %1797 }
 0x3af   : > { %1799 = vrcp.f32 %v853_v33  ;;  %v852_v36 = vadd.f32 1.0, %v1798_v34  ;;  %v1030_v34 = vpop.permute.xlu1 %1029 }
 0x3b0   : > { %1801 = vrcp.f32 %v851_v32 }
 0x3b1   : > { %1803 = vrcp.f32 %v852_v36 }
 0x3b2   : > { %1805 = vrcp.f32 %v850_v35 }
 0x3bc   : > { %v1800_v37 = vpop.eup %1799 }
 0x3bd   : > { %v1802_v38 = vpop.eup %1801  ;;  %v861_v39 = vmul.f32 %v1800_v37, %v835_v21 }
 0x3be   : > { %v1804_v40 = vpop.eup %1803  ;;  %v859_v44 = vmul.f32 %v1802_v38, %v825_v13 }
 0x3bf   : > { %v860_v41 = vmul.f32 %v1804_v40, %v830_v25  ;;  %1662 = vmatprep.subr.mxu0 %v861_v39  ;;  %v1806_v43 = vpop.eup %1805 }
 0x3c0   : > { %1663 = vmatpush3.msra.mxu0 %v861_v39  ;;  %v858_v47 = vmul.f32 %v1806_v43, %v820_v17 }
 0x3c1   : > { %1664 = vmatprep.subr.mxu0 %v860_v41 }
 0x3c2   : > { %1665 = vmatpush3.msra.mxu0 %v860_v41 }
 0x3c3   : > { %1666 = vmatprep.subr.mxu0 %v859_v44 }
 0x3c4   : > { %1667 = vmatpush3.msra.mxu0 %v859_v44 }
 0x3c5   : > { %1668 = vmatprep.subr.mxu0 %v858_v47 }
 0x3c6   : > { %1669 = vmatpush3.msra.mxu0 %v858_v47 }
 0x3c7   : > { %1671 = vmatmul.mubr.msk.f32.vlgmr.msra.gmra.mxu0 %vm434_vm2, %v1515_v49 }
 0x3c8   : > { %1673 = vmatprep.mubr.msk.f32.mxu0 %vm434_vm2, %v1516_v50 }
 0x3cb   : > { %1674 = vmatmul.mubr.msk.f32.gmra.mxu0 %vm434_vm2, %v1517_v51 }
 0x3cc   : > { %1698 = vmatprep.mubr.msk.f32.mxu0 %vm434_vm2, %v1538_v28 }
 0x487   : > { %v1672_v56 = vpop.f32.mrf.mxu0 }
 0x488   : > { %v976_v57 = vadd.f32 %v1672_v56, %v880_v55 }
 0x489   : > { %v970_v59 = vpop.f32.mrf.mxu0 }
 0x48a   : > { %v990_v60 = vsub.f32 0.0, %v976_v57  ;;  %v971_v61 = vadd.f32 %v970_v59, %v875_v58 }
 0x48b   : > { %v1675_v62 = vpop.f32.mrf.mxu0 }
 0x48c   : > { %v995_v63 = vmul.f32 1.442695, %v990_v60  ;;  %v989_v0 = vsub.f32 0.0, %v971_v61  ;;  %v986_v1 = vadd.f32 %v1675_v62, %v890_v53 }
 0x48d   : > { %v980_v2 = vpop.f32.mrf.mxu0 }
 0x48e   : > { %1807 = vpow2.f32 %v995_v63  ;;  %v993_v3 = vmul.f32 1.442695, %v989_v0  ;;  %v992_v5 = vsub.f32 0.0, %v986_v1  ;;  %v981_v45 = vadd.f32 %v980_v2, %v885_v54 }
 0x490   : > { %1809 = vpow2.f32 %v993_v3  ;;  %v999_v46 = vmul.f32 1.442695, %v992_v5  ;;  %v991_v48 = vsub.f32 0.0, %v981_v45 }
 0x492   : > { %1811 = vpow2.f32 %v999_v46  ;;  %v997_v8 = vmul.f32 1.442695, %v991_v48  ;;  %v1540_v46 = vld [vmem:[%s2320_s3 + $0xb0] sm:$0xff]  ;;  %v1541_v48 = vld [vmem:[%s2320_s3 + $0xb8] sm:$0xff] }
 0x494   : > { %1813 = vpow2.f32 %v997_v8  ;;  %v1918_v8 = vmov 0.0  }
 0x49b   : > { %v1808_v9 = vpop.eup %1807 }
 0x49c   : > { %v1002_v11 = vadd.f32 1.0, %v1808_v9  ;;  %v1196_v9 = vpop.permute.xlu0 %1195 }
 0x49d   : > { %v1810_v10 = vpop.eup %1809 }
 0x49e   : > { %v1001_v13 = vadd.f32 1.0, %v1810_v10  ;;  %1815 = vrcp.f32 %v1002_v11  ;;  %v1191_v10 = vpop.permute.xlu1 %1190 }
 0x49f   : > { %v1812_v12 = vpop.eup %1811 }
 0x4a0   : > { %v1004_v14 = vadd.f32 1.0, %v1812_v12  ;;  %v1186_v11 = vpop.permute.xlu0 %1185 }
 0x4a1   : > { %v1814_v15 = vpop.eup %1813 }
 0x4a2   : > { %1817 = vrcp.f32 %v1004_v14  ;;  %v1003_v16 = vadd.f32 1.0, %v1814_v15  ;;  %v1181_v14 = vpop.permute.xlu1 %1180 }
 0x4a3   : > { %1819 = vrcp.f32 %v1001_v13 }
 0x4a4   : > { %1821 = vrcp.f32 %v1003_v16 }
 0x4ab   : > { %v1816_v17 = vpop.eup %1815 }
 0x4ac   : > { %v1010_v22 = vmul.f32 %v1816_v17, %v976_v57 }
 0x4ae   : > { %v2231_v27 = vadd.f32 %v1010_v22, %v2179_v7  ;;  %v1528_v7 = vld [vmem:[%s2320_s3 + $0x90] sm:$0xff] }
 0x4af   : > { %v1818_v18 = vpop.eup %1817 }
 0x4b0   : > { %v1820_v19 = vpop.eup %1819  ;;  %v1012_v20 = vmul.f32 %v1818_v18, %v986_v1 }
 0x4b1   : > { %v1822_v21 = vpop.eup %1821  ;;  %v1009_v25 = vmul.f32 %v1820_v19, %v971_v61 }
 0x4b2   : > { %v1011_v23 = vmul.f32 %v1822_v21, %v981_v45  ;;  %v2222_v24 = vadd.f32 %v1012_v20, %v2170_v4  ;;  %v1539_v45 = vld [vmem:[%s2320_s3 + $0xa8] sm:$0xff] }
 0x4b3   : > { %v2236_v4 = vadd.f32 %v1009_v25, %v2184_v42  ;;  %v1529_v42 = vld [vmem:[%s2320_s3 + $0x98] sm:$0xff] }
 0x4b4   : > { %1676 = vmatprep.subr.mxu1 %v2222_v24  ;;  %v2226_v26 = vadd.f32 %v1011_v23, %v2174_v6  ;;  %v1527_v6 = vld [vmem:[%s2320_s3 + $0x88] sm:$0xff] }
 0x4b5   : > { %1677 = vmatpush3.msra.mxu1 %v2222_v24 }
 0x4b6   : > { %1678 = vmatprep.subr.mxu1 %v2226_v26 }
 0x4b7   : > { %1679 = vmatpush3.msra.mxu1 %v2226_v26 }
 0x4b8   : > { %1680 = vmatprep.subr.mxu1 %v2231_v27 }
 0x4b9   : > { %1681 = vmatpush3.msra.mxu1 %v2231_v27 }
 0x4ba   : > { %1682 = vmatprep.subr.mxu1 %v2236_v4 }
 0x4bb   : > { %1683 = vmatpush3.msra.mxu1 %v2236_v4 }
 0x4bc   : > { %1685 = vmatmul.mubr.msk.f32.vlgmr.msra.gmra.mxu1 %vm434_vm2, %v1527_v6  ;;  %1704 = vmatprep.subr.mxu1 %v1918_v8 }
 0x4bd   : > { %1687 = vmatprep.mubr.msk.f32.mxu1 %vm434_vm2, %v1528_v7 }
 0x4c0   : > { %1688 = vmatmul.mubr.msk.f32.gmra.mxu1 %vm434_vm2, %v1529_v42 }
 0x4c1   : > { %1712 = vmatprep.mubr.msk.f32.mxu1 %vm1919_vm3, %v1918_v8 }
 0x57c   : > { %v1686_v32 = vpop.f32.mrf.mxu1 }
 0x57d   : > { %v1131_v33 = vadd.f32 %v1686_v32, %v1035_v31 }
 0x57e   : > { %v1125_v35 = vpop.f32.mrf.mxu1 }
 0x57f   : > { %v1145_v36 = vsub.f32 0.0, %v1131_v33  ;;  %v1126_v37 = vadd.f32 %v1125_v35, %v1030_v34 }
 0x580   : > { %v1689_v38 = vpop.f32.mrf.mxu1 }
 0x581   : > { %v1150_v39 = vmul.f32 1.442695, %v1145_v36  ;;  %v1144_v40 = vsub.f32 0.0, %v1126_v37  ;;  %v1141_v41 = vadd.f32 %v1689_v38, %v1045_v29 }
 0x582   : > { %v1135_v43 = vpop.f32.mrf.mxu1 }
 0x583   : > { %v1148_v44 = vmul.f32 1.442695, %v1144_v40  ;;  %v1147_v47 = vsub.f32 0.0, %v1141_v41  ;;  %v1136_v49 = vadd.f32 %v1135_v43, %v1040_v30  ;;  %1823 = vpow2.f32 %v1150_v39 }
 0x585   : > { %v1154_v50 = vmul.f32 1.442695, %v1147_v47  ;;  %v1146_v51 = vsub.f32 0.0, %v1136_v49  ;;  %1825 = vpow2.f32 %v1148_v44 }
 0x587   : > { %1827 = vpow2.f32 %v1154_v50  ;;  %v1152_v52 = vmul.f32 1.442695, %v1146_v51 }
 0x589   : > { %1829 = vpow2.f32 %v1152_v52 }
 0x590   : > { %v1824_v53 = vpop.eup %1823 }
 0x591   : > { %v1157_v56 = vadd.f32 1.0, %v1824_v53  ;;  %v1323_v53 = vld [vmem:[%s2322_s5] sm:$0x1] }
 0x592   : > { %v1826_v54 = vpop.eup %1825 }
 0x593   : > { %v1156_v59 = vadd.f32 1.0, %v1826_v54 }
 0x594   : > { %v1828_v55 = vpop.eup %1827 }
 0x595   : > { %v1159_v57 = vadd.f32 1.0, %v1828_v55  ;;  %v1328_v55 = vpop.permute.xlu0 %1327 }
 0x596   : > { %v1830_v58 = vpop.eup %1829 }
 0x597   : > { %1831 = vrcp.f32 %v1159_v57  ;;  %v1158_v60 = vadd.f32 1.0, %v1830_v58 }
 0x598   : > { %1833 = vrcp.f32 %v1157_v56 }
 0x599   : > { %1835 = vrcp.f32 %v1158_v60 }
 0x59a   : > { %1837 = vrcp.f32 %v1156_v59 }
 0x5a4   : > { %v1832_v61 = vpop.eup %1831 }
 0x5a5   : > { %v1834_v62 = vpop.eup %1833  ;;  %v1167_v63 = vmul.f32 %v1832_v61, %v1141_v41 }
 0x5a6   : > { %v1836_v0 = vpop.eup %1835  ;;  %v1165_v3 = vmul.f32 %v1834_v62, %v1131_v33 }
 0x5a7   : > { %v1166_v1 = vmul.f32 %v1836_v0, %v1136_v49  ;;  %1690 = vmatprep.subr.mxu0 %v1167_v63  ;;  %v1838_v2 = vpop.eup %1837 }
 0x5a8   : > { %1691 = vmatpush3.msra.mxu0 %v1167_v63  ;;  %v1164_v5 = vmul.f32 %v1838_v2, %v1126_v37 }
 0x5a9   : > { %1692 = vmatprep.subr.mxu0 %v1166_v1 }
 0x5aa   : > { %1693 = vmatpush3.msra.mxu0 %v1166_v1 }
 0x5ab   : > { %1694 = vmatprep.subr.mxu0 %v1165_v3 }
 0x5ac   : > { %1695 = vmatpush3.msra.mxu0 %v1165_v3 }
 0x5ad   : > { %1696 = vmatprep.subr.mxu0 %v1164_v5 }
 0x5ae   : > { %1697 = vmatpush3.msra.mxu0 %v1164_v5 }
 0x5af   : > { %1699 = vmatmul.mubr.msk.f32.vlgmr.msra.gmra.mxu0 %vm434_vm2, %v1539_v45 }
 0x5b0   : > { %1701 = vmatprep.mubr.msk.f32.mxu0 %vm434_vm2, %v1540_v46 }
 0x5b3   : > { %1702 = vmatmul.mubr.msk.f32.gmra.mxu0 %vm434_vm2, %v1541_v48 }
 0x66f   : > { %v1700_v12 = vpop.f32.mrf.mxu0 }
 0x670   : > { %v1282_v13 = vadd.f32 %v1700_v12, %v1186_v11 }
 0x671   : > { %v1276_v15 = vpop.f32.mrf.mxu0 }
 0x672   : > { %v1296_v16 = vsub.f32 0.0, %v1282_v13  ;;  %v1277_v17 = vadd.f32 %v1276_v15, %v1181_v14 }
 0x673   : > { %v1703_v18 = vpop.f32.mrf.mxu0 }
 0x674   : > { %v1301_v19 = vmul.f32 1.442695, %v1296_v16  ;;  %v1295_v20 = vsub.f32 0.0, %v1277_v17  ;;  %v1292_v21 = vadd.f32 %v1703_v18, %v1196_v9 }
 0x675   : > { %v1286_v22 = vpop.f32.mrf.mxu0 }
 0x676   : > { %1839 = vpow2.f32 %v1301_v19  ;;  %v1299_v23 = vmul.f32 1.442695, %v1295_v20  ;;  %v1298_v25 = vsub.f32 0.0, %v1292_v21  ;;  %v1287_v6 = vadd.f32 %v1286_v22, %v1191_v10 }
 0x678   : > { %1841 = vpow2.f32 %v1299_v23  ;;  %v1305_v7 = vmul.f32 1.442695, %v1298_v25  ;;  %v1297_v42 = vsub.f32 0.0, %v1287_v6 }
 0x67a   : > { %1843 = vpow2.f32 %v1305_v7  ;;  %v1303_v28 = vmul.f32 1.442695, %v1297_v42 }
 0x67c   : > { %1845 = vpow2.f32 %v1303_v28 }
 0x683   : > { %v1840_v29 = vpop.eup %1839 }
 0x684   : > { %v1308_v31 = vadd.f32 1.0, %v1840_v29 }
 0x685   : > { %v1842_v30 = vpop.eup %1841 }
 0x686   : > { %v1307_v33 = vadd.f32 1.0, %v1842_v30  ;;  %1847 = vrcp.f32 %v1308_v31 }
 0x687   : > { %v1844_v32 = vpop.eup %1843 }
 0x688   : > { %v1310_v34 = vadd.f32 1.0, %v1844_v32 }
 0x689   : > { %v1846_v35 = vpop.eup %1845 }
 0x68a   : > { %1849 = vrcp.f32 %v1310_v34  ;;  %v1309_v36 = vadd.f32 1.0, %v1846_v35 }
 0x68b   : > { %1851 = vrcp.f32 %v1307_v33 }
 0x68c   : > { %1853 = vrcp.f32 %v1309_v36 }
 0x693   : > { %v1848_v37 = vpop.eup %1847 }
 0x694   : > { %v1316_v43 = vmul.f32 %v1848_v37, %v1282_v13 }
 0x696   : > { %v1320_v51 = vadd.f32 %v1316_v43, %v2231_v27 }
 0x697   : > { %v1850_v38 = vpop.eup %1849 }
 0x698   : > { %v1852_v39 = vpop.eup %1851  ;;  %v1318_v40 = vmul.f32 %v1850_v38, %v1292_v21 }
 0x699   : > { %v1854_v41 = vpop.eup %1853  ;;  %v1315_v49 = vmul.f32 %v1852_v39, %v1277_v17 }
 0x69a   : > { %v1322_v44 = vadd.f32 %v1318_v40, %v2222_v24  ;;  %v1317_v47 = vmul.f32 %v1854_v41, %v1287_v6  ;;  %v1330_v24 = vlaneseq }
 0x69b   : > { %v1319_v52 = vadd.f32 %v1315_v49, %v2236_v4 }
 0x69c   : > { %v1321_v50 = vadd.f32 %v1317_v47, %v2226_v26  ;;  %1705 = vmatpush3.msra.mxu1 %v1322_v44  ;;  %v1331_v26 = vshrl.u32 %v1330_v24, 7 }
 0x69d   : > { %1706 = vmatprep.subr.mxu1 %v1918_v8 }
 0x69e   : > { %1707 = vmatpush3.msra.mxu1 %v1321_v50  ;;  %v1332_v54 = vsub.s32 0, %v1331_v26 }
 0x69f   : > { %1708 = vmatprep.subr.mxu1 %v1918_v8 }
 0x6a0   : > { %1709 = vmatpush3.msra.mxu1 %v1320_v51  ;;  %v1333_v27 = vrot.slane %v1328_v55, %v1332_v54 }
 0x6a1   : > { %1710 = vmatprep.subr.mxu1 %v1918_v8 }
 0x6a2   : > { %1711 = vmatpush3.msra.mxu1 %v1319_v52 }
 0x6a3   : > { %1713 = vmatmul.mubr.msk.f32.vlgmr.msra.gmra.mxu1 %vm434_vm2, %v1323_v53 }
 0x763   : > { %v1403_v4 = vpop.f32.mrf.mxu1 }
 0x764   : > { %v1404_v56 = vadd.f32 %v1403_v4, %v1333_v27 }
 0x765   : > { %v1714_v57 = vpop.f32.mrf.mxu1 }
 0x766   : > { %1407 = vst [vmem:[%s270_s15] sm:$0x1] %v1404_v56 }
 0x767   : > { %1868 = shalt.err (!%p1865_p3)
}
 0x768   : > { %s1869_s24 = scalar_lea.hbm %s2282_s19, 16  ;;  %s1873_s9 = scalar_lea.hbm %s2324_s7, 32 }
 0x769   : > { %p1870_p4 = scmp.ne.s32.totalorder %s2282_s19, %s1869_s24  ;;  %p1874_p9 = scmp.lt.s32.totalorder %s2282_s19, %s2324_s7 }
 0x76a   : > { %p1875_p10 = scmp.lt.s32.totalorder %s1873_s9, %s1869_s24 }
 0x76b   : > { %p1871_p7 = pnand %p1870_p4, %p2002_p5 }
 0x76c   : > { %p1876_p11 = por %p1875_p10, %p1874_p9 }
 0x76d   : > { %p1872_p8 = pneg %p1871_p7 }
 0x76f   : > { %p1877_p12 = pnand %p1876_p11, %p1872_p8 }
 0x771   : > { %1880 = shalt.err (!%p1877_p12)
}
 0x772   : > { %1715 = dma.vmem_to_hbm [thread:$0]  (%p2002_p5), %s1422_s16, 16, %s2282_s19, %s1409_s20  }
 0x773 PF: > { %p1721_p13 = scmp.ge.s32.totalorder %s1915_s29, 2  ;;  %s1433_s15 = sand.u32 1, %s1903_s26  }
 0x774   : > { %s1434_s17 = scalar_lea.sflag [#allocation4], %s1433_s15 }
 0x775   : > { %p1718_p0 = pnand %p1721_p13, %p2006_p6 }
 0x777   : > { %p1719_p1 = pneg %p1718_p0 }
 0x779   : > { %1898 = dma.done.wait (%p1719_p1), %s1434_s17, 16  }
 0x77a   : > { %1900 = vsyncadd (%p1719_p1), %s1434_s17, 4294967280  ;;  %p19_p2 = scmp.ge.s32.totalorder %s1989_s8, 4   ;;  %s2327_s26 = smov %s1907_s27 }
 0x77b   : > { %s2328_s27 = smov %s1911_s28  ;;  %s2329_s28 = smov %s2000_s11 }
 0x77c   : > { %s2330_s29 = smov %s1989_s8  ;;  %21 = sbr.rel (!%p19_p2) target bundleno = 6 (0x6), region = 93 }
 0x781   :  { %1438 = vsyncpa [#allocation4], 1 }
 0x782   :  { %1440 = vsyncpa [#allocation4 + $0x1], 1 }

</bundles_post_ra>
